<compile_context>
chip_gen: v6e
topology: v6e:2x2x1
jax: 0.10.0
libtpu: 0.0.40
codegen_flags: <defaults>
</compile_context>

<pallas_src>
import math

import jax
import jax.numpy as jnp
from jax.experimental import pallas as pl
from jax.experimental.pallas import tpu as pltpu

M = 128  # hidden width (module-level constant in the PyTorch spec)


def _round_up(n, k):
    return ((n + k - 1) // k) * k


def _mlp_kernel(x_ref, w1_ref, b1_ref, w2_ref, b2_ref, o_ref):
    # Cast x to bf16 in-kernel (hidden under the DMA) -> MXU fast path.
    x = x_ref[...].astype(jnp.bfloat16)
    # fc1 on the MXU: bf16 inputs, f32 accumulation.
    h = jnp.dot(x, w1_ref[...], preferred_element_type=jnp.float32)
    # Bias + ReLU in f32 on the VPU (b1 is (1, M) -> lane broadcast).
    h = jnp.maximum(h + b1_ref[...], 0.0)
    # fc2 on the MXU: w2/b2 already carry the 1/sqrt(M) NTK scale.
    y = jnp.dot(h.astype(jnp.bfloat16), w2_ref[...],
                preferred_element_type=jnp.float32)
    # Narrow (tb, D_out) f32 store — D_out equals the full last dim.
    o_ref[...] = (y + b2_ref[...]).astype(o_ref.dtype)


def prepare_params(w1, b1, w2, b2):
    """One-time parameter prep.

    Inputs use the pre-transposed x@W layout:
      w1: (D_in, M), b1: (M,), w2: (M, D_out), b2: (D_out,)
    Folds the 1/sqrt(M) NTK scale into w2/b2, casts matmul operands to bf16
    and biases to 2-D f32.  No lane padding of fc2 (narrow output is cheaper
    for this memory-bound kernel).
    """
    d_out = w2.shape[1]
    scale = 1.0 / math.sqrt(M)
    return (
        w1.astype(jnp.bfloat16),                                  # (D_in, M)
        b1.reshape(1, M).astype(jnp.float32),                     # (1, M)
        (w2.astype(jnp.float32) * scale).astype(jnp.bfloat16),    # (M, D_out)
        (b2.astype(jnp.float32) * scale).reshape(1, d_out),       # (1, D_out)
    )


def _choose_tiles(batch, block_b):
    """Pick (n_tiles, tb): tb <= block_b, tb multiple of 16, padding < 16/tile.

    For B >= 512 force at least 2 grid steps so v7x's two TensorCores both get
    work via the "parallel" batch axis (v5e/v6e are indifferent).
    """
    n_tiles = -(-batch // block_b)          # ceil
    if batch >= 512 and n_tiles < 2:
        n_tiles = 2
    tb = _round_up(-(-batch // n_tiles), 16)
    return n_tiles, tb


def net_forward(x, params, *, block_b=1024):
    """x: (B, D_in) f32/bf16; params: output of prepare_params. Returns (B, D_out) f32."""
    w1, b1, w2, b2 = params
    batch, d_in = x.shape
    m_hidden = w1.shape[1]
    d_out = w2.shape[1]

    n_tiles, tb = _choose_tiles(batch, block_b)
    b_pad = n_tiles * tb

    x_p = x if b_pad == batch else jnp.pad(x, ((0, b_pad - batch), (0, 0)))

    out = pl.pallas_call(
        _mlp_kernel,
        out_shape=jax.ShapeDtypeStruct((b_pad, d_out), jnp.float32),
        grid=(n_tiles,),
        in_specs=[
            pl.BlockSpec((tb, d_in), lambda i: (i, 0)),             # x: streamed per tile
            pl.BlockSpec((d_in, m_hidden), lambda i: (0, 0)),       # w1: resident
            pl.BlockSpec((1, m_hidden), lambda i: (0, 0)),          # b1: resident
            pl.BlockSpec((m_hidden, d_out), lambda i: (0, 0)),      # w2: resident
            pl.BlockSpec((1, d_out), lambda i: (0, 0)),             # b2: resident
        ],
        out_specs=pl.BlockSpec((tb, d_out), lambda i: (i, 0)),      # narrow output
        compiler_params=pltpu.CompilerParams(
            dimension_semantics=("parallel",),
        ),
    )(x_p, w1, b1, w2, b2)

    return out if b_pad == batch else out[:batch]


def init_params(key, input_size, output_size):
    """Deterministic init mimicking nn.Linear's uniform(-1/sqrt(fan_in), 1/sqrt(fan_in)).

    Weights stored pre-transposed as (in_features, out_features)."""
    k1, k2, k3, k4 = jax.random.split(key, 4)
    bound1 = 1.0 / math.sqrt(input_size)
    bound2 = 1.0 / math.sqrt(M)
    w1 = jax.random.uniform(k1, (input_size, M), jnp.float32, -bound1, bound1)
    b1 = jax.random.uniform(k2, (M,), jnp.float32, -bound1, bound1)
    w2 = jax.random.uniform(k3, (M, output_size), jnp.float32, -bound2, bound2)
    b2 = jax.random.uniform(k4, (output_size,), jnp.float32, -bound2, bound2)
    return w1, b1, w2, b2


def _reference(x, w1, b1, w2, b2):
    # Pure-JAX f32 reference with the same math as the PyTorch forward.
    return (jnp.maximum(x @ w1 + b1, 0.0) @ w2 + b2) / math.sqrt(M)


if __name__ == "__main__":
    input_size = 32
    output_size = 8

    key = jax.random.PRNGKey(0)
    kx, kp, kx2, kx3 = jax.random.split(key, 4)
    w1, b1, w2, b2 = init_params(kp, input_size, output_size)
    params = prepare_params(w1, b1, w2, b2)

    fwd = jax.jit(net_forward, static_argnames=("block_b",))

    def check(x, block_b=1024):
        out = jax.block_until_ready(fwd(x, params, block_b=block_b))
        ref = _reference(x, w1, b1, w2, b2)
        assert out.shape == ref.shape, (out.shape, ref.shape)
        # bf16 matmul inputs (f32 accumulation) -> loosened tolerance vs f32 ref.
        assert jnp.allclose(out, ref, atol=1e-2, rtol=5e-2), float(
            jnp.max(jnp.abs(out - ref)))

    # Case 1: tiny batch (single 16-row tile, padded 8 -> 16).
    check(jax.random.normal(kx, (8, input_size), jnp.float32))

    # Case 2: non-multiple batch with a small tile cap -> grid=3, bounded padding.
    check(jax.random.normal(kx2, (300, input_size), jnp.float32), block_b=128)

    # Case 3: moderate batch at default tile -> >=2 grid steps (v7x dual-TC path).
    check(jax.random.normal(kx3, (600, input_size), jnp.float32))

    print("KERNEL_OK")
</pallas_src>

<mosaic_0001>
module attributes {stable_mosaic.version = 11 : i64} {
  func.func @_mlp_kernel(%arg0: i32, %arg1: memref<16x32xf32, #tpu.memory_space<vmem>>, %arg2: memref<32x128xbf16, #tpu.memory_space<vmem>>, %arg3: memref<1x128xf32, #tpu.memory_space<vmem>>, %arg4: memref<128x8xbf16, #tpu.memory_space<vmem>>, %arg5: memref<1x8xf32, #tpu.memory_space<vmem>>, %arg6: memref<16x8xf32, #tpu.memory_space<vmem>>) attributes {dimension_semantics = [#tpu.dimension_semantics<parallel>], iteration_bounds = array<i64: 1>, scalar_prefetch = 0 : i64, scratch_operands = 0 : i64, tpu.core_type = #tpu.core_type<tc>, window_params = [{transform_indices = @transform_0, window_bounds = array<i64: 16, 32>}, {pipeline_mode = #tpu.pipeline_mode<synchronous>, transform_indices = @transform_1, window_bounds = array<i64: 32, 128>}, {pipeline_mode = #tpu.pipeline_mode<synchronous>, transform_indices = @transform_2, window_bounds = array<i64: 1, 128>}, {pipeline_mode = #tpu.pipeline_mode<synchronous>, transform_indices = @transform_3, window_bounds = array<i64: 128, 8>}, {pipeline_mode = #tpu.pipeline_mode<synchronous>, transform_indices = @transform_4, window_bounds = array<i64: 1, 8>}, {transform_indices = @transform_5, window_bounds = array<i64: 16, 8>}]} {
    %c0 = arith.constant 0 : index
    %c0_0 = arith.constant 0 : index
    %0 = vector.load %arg1[%c0, %c0_0] : memref<16x32xf32, #tpu.memory_space<vmem>>, vector<16x32xf32>
    %1 = arith.truncf %0 : vector<16x32xf32> to vector<16x32xbf16>
    %c0_1 = arith.constant 0 : index
    %c0_2 = arith.constant 0 : index
    %2 = vector.load %arg2[%c0_1, %c0_2] : memref<32x128xbf16, #tpu.memory_space<vmem>>, vector<32x128xbf16>
    %cst = arith.constant dense<0.000000e+00> : vector<16x128xf32>
    %3 = tpu.matmul %1, %2, %cst {dimension_numbers = #tpu.dot_dimension_numbers<[1], [0], [0], [1], [0, 0, 1, 1], [], []>} : vector<16x32xbf16>, vector<32x128xbf16>, vector<16x128xf32> -> vector<16x128xf32>
    %c0_3 = arith.constant 0 : index
    %c0_4 = arith.constant 0 : index
    %4 = vector.load %arg3[%c0_3, %c0_4] : memref<1x128xf32, #tpu.memory_space<vmem>>, vector<1x128xf32>
    %5 = vector.broadcast %4 : vector<1x128xf32> to vector<16x128xf32>
    %6 = arith.addf %3, %5 : vector<16x128xf32>
    %cst_5 = arith.constant 0.000000e+00 : f32
    %7 = vector.broadcast %cst_5 : f32 to vector<16x128xf32>
    %8 = arith.maximumf %6, %7 : vector<16x128xf32>
    %9 = arith.truncf %8 : vector<16x128xf32> to vector<16x128xbf16>
    %c0_6 = arith.constant 0 : index
    %c0_7 = arith.constant 0 : index
    %10 = vector.load %arg4[%c0_6, %c0_7] : memref<128x8xbf16, #tpu.memory_space<vmem>>, vector<128x8xbf16>
    %cst_8 = arith.constant dense<0.000000e+00> : vector<16x8xf32>
    %11 = tpu.matmul %9, %10, %cst_8 {dimension_numbers = #tpu.dot_dimension_numbers<[1], [0], [0], [1], [0, 0, 1, 1], [], []>} : vector<16x128xbf16>, vector<128x8xbf16>, vector<16x8xf32> -> vector<16x8xf32>
    %c0_9 = arith.constant 0 : index
    %c0_10 = arith.constant 0 : index
    %12 = vector.load %arg5[%c0_9, %c0_10] : memref<1x8xf32, #tpu.memory_space<vmem>>, vector<1x8xf32>
    %13 = vector.broadcast %12 : vector<1x8xf32> to vector<16x8xf32>
    %14 = arith.addf %11, %13 : vector<16x8xf32>
    %c0_11 = arith.constant 0 : index
    %c0_12 = arith.constant 0 : index
    %15 = vector.load %arg6[%c0_11, %c0_12] : memref<16x8xf32, #tpu.memory_space<vmem>>, vector<16x8xf32>
    tpu.vector_store %arg6[%c0_11, %c0_12], %14 {strides = array<i32>} : memref<16x8xf32, #tpu.memory_space<vmem>>, vector<16x8xf32>,
    return
  }
  func.func @transform_0(%arg0: i32) -> (i32, i32) {
    %c0_i32 = arith.constant 0 : i32
    %c0_i32_0 = arith.constant 0 : i32
    return %arg0, %c0_i32 : i32, i32
  }
  func.func @transform_1(%arg0: i32) -> (i32, i32) {
    %c0_i32 = arith.constant 0 : i32
    %c0_i32_0 = arith.constant 0 : i32
    %c0_i32_1 = arith.constant 0 : i32
    return %c0_i32, %c0_i32_0 : i32, i32
  }
  func.func @transform_2(%arg0: i32) -> (i32, i32) {
    %c0_i32 = arith.constant 0 : i32
    %c0_i32_0 = arith.constant 0 : i32
    %c0_i32_1 = arith.constant 0 : i32
    return %c0_i32, %c0_i32_0 : i32, i32
  }
  func.func @transform_3(%arg0: i32) -> (i32, i32) {
    %c0_i32 = arith.constant 0 : i32
    %c0_i32_0 = arith.constant 0 : i32
    %c0_i32_1 = arith.constant 0 : i32
    return %c0_i32, %c0_i32_0 : i32, i32
  }
  func.func @transform_4(%arg0: i32) -> (i32, i32) {
    %c0_i32 = arith.constant 0 : i32
    %c0_i32_0 = arith.constant 0 : i32
    %c0_i32_1 = arith.constant 0 : i32
    return %c0_i32, %c0_i32_0 : i32, i32
  }
  func.func @transform_5(%arg0: i32) -> (i32, i32) {
    %c0_i32 = arith.constant 0 : i32
    %c0_i32_0 = arith.constant 0 : i32
    return %arg0, %c0_i32 : i32, i32
  }
}

</mosaic_0001>

<bundles_post_ra>
// kernel: net_forward.1
= control target key start
LH: loop header
LB: loop body
LE: loop exit
PB: predicated region body
PF: predicated region fallthrough
CT: control target
= control target key end

     0   :  { %v279_v0 = vmov 0.0   ;;  %vm280_vm0 = vmmov 0   ;;  %vm47_vm1 = vcmask 261120   ;;  %vm207_vm2 = vcmask 64512   ;;  %s359_s1 = inlined_call_operand.vmem [shape: bf16[32,128], index: 1, kind: input, shape index: {}]   ;;  %s360_s0 = inlined_call_operand.vmem [shape: f32[16,32], index: 0, kind: input, shape index: {}]   ;;  %s361_s3 = inlined_call_operand.vmem [shape: bf16[128,8], index: 3, kind: input, shape index: {}]   ;;  %s362_s2 = inlined_call_operand.vmem [shape: f32[1,128], index: 2, kind: input, shape index: {}]   ;;  %s363_s4 = inlined_call_operand.vmem [shape: f32[1,8], index: 4, kind: input, shape index: {}]   ;;  %s364_s5 = inlined_call_operand.vmem [shape: f32[16,8], index: 5, kind: output, shape index: {}]  }
   0x1   :  { %239 = vmatprep.subr.bf16.mxu0 %v279_v0  ;;  %v269_v1 = vld [vmem:[%s359_s1 + $0x8] sm:$0xff]   ;;  %243 = vmatprep.mubr.msk.bf16.mxu0 %vm280_vm0, %v279_v0  ;;  %v270_v2 = vld [vmem:[%s359_s1] sm:$0xff]   ;;  %v271_v5 = vld [vmem:[%s361_s3 + $0x38] sm:$0xff]  }
   0x2   :  { %247 = vmatprep.subr.bf16.mxu1 %v279_v0  ;;  %263 = vmatprep.mubr.msk.bf16.mxu1 %vm280_vm0, %v279_v0  ;;  %v21_v3 = vld [vmem:[%s360_s0] sm:$0xff]  ;;  %v22_v4 = vld [vmem:[%s360_s0 + $0x8] sm:$0xff]  ;;  %v272_v7 = vld [vmem:[%s361_s3 + $0x30] sm:$0xff]  }
   0x3   :  { %240 = vmatpush3.bf16.msra.mxu0 %v269_v1  ;;  %v23_v6 = vpack.c.bf16 %v22_v4, %v21_v3  ;;  %248 = vmatpush3.bf16.msra.mxu1 %v271_v5  ;;  %v273_v8 = vld [vmem:[%s361_s3 + $0x28] sm:$0xff]   ;;  %v274_v9 = vld [vmem:[%s361_s3 + $0x20] sm:$0xff]   ;;  %v275_v10 = vld [vmem:[%s361_s3 + $0x18] sm:$0xff]  }
   0x4   :  { %241 = vmatprep.subr.bf16.mxu0 %v279_v0  ;;  %249 = vmatprep.subr.bf16.mxu1 %v279_v0  ;;  %v276_v11 = vld [vmem:[%s361_s3 + $0x10] sm:$0xff]   ;;  %v277_v12 = vld [vmem:[%s361_s3 + $0x8] sm:$0xff]   ;;  %v278_v13 = vld [vmem:[%s361_s3] sm:$0xff]  }
   0x5   :  { %v214_v14 = vld [vmem:[%s362_s2] ss:$0 sm:$0xff] }
   0x6   :  { %v218_v24 = vld [vmem:[%s363_s4] ss:$0 sm:$0xff] }
   0x7   :  { %242 = vmatpush3.bf16.msra.mxu0 %v270_v2  ;;  %250 = vmatpush3.bf16.msra.mxu1 %v272_v7 }
   0x8   :  { %251 = vmatprep.subr.bf16.mxu1 %v279_v0 }
   0xa   :  { %244 = vmatmul.mubr.msk.bf16.vlgmr.msra.gmra.mxu0 %vm47_vm1, %v23_v6 }
   0xb   :  { %252 = vmatpush3.bf16.msra.mxu1 %v273_v8 }
   0xc   :  { %253 = vmatprep.subr.bf16.mxu1 %v279_v0 }
   0xf   :  { %254 = vmatpush3.bf16.msra.mxu1 %v274_v9 }
  0x10   :  { %255 = vmatprep.subr.bf16.mxu1 %v279_v0 }
  0x13   :  { %256 = vmatpush3.bf16.msra.mxu1 %v275_v10 }
  0x14   :  { %257 = vmatprep.subr.bf16.mxu1 %v279_v0 }
  0x17   :  { %258 = vmatpush3.bf16.msra.mxu1 %v276_v11 }
  0x18   :  { %259 = vmatprep.subr.bf16.mxu1 %v279_v0 }
  0x1b   :  { %260 = vmatpush3.bf16.msra.mxu1 %v277_v12 }
  0x1c   :  { %261 = vmatprep.subr.bf16.mxu1 %v279_v0 }
  0x1f   :  { %262 = vmatpush3.bf16.msra.mxu1 %v278_v13 }
  0xca   :  { %v85_v15 = vpop.f32.mrf.mxu0 }
  0xcb   :  { %v86_v17 = vadd.f32 %v214_v14, %v85_v15 }
  0xcc   :  { %v245_v16 = vpop.f32.mrf.mxu0 }
  0xcd   :  { %v92_v21 = vmax.f32 %v86_v17, 0.0 }
  0xce   :  { %v88_v18 = vpop.f32.mrf.mxu0 }
  0xcf   :  { %v89_v19 = vadd.f32 %v214_v14, %v88_v18 }
  0xd0   :  { %v246_v20 = vpop.f32.mrf.mxu0 }
  0xd1   :  { %v93_v22 = vmax.f32 %v89_v19, 0.0 }
  0xd3   :  { %v94_v23 = vpack.c.bf16 %v93_v22, %v92_v21 }
  0xd5   :  { %264 = vmatmul.mubr.bf16.vlgmr.msra.gmra.mxu1 %v94_v23 }
 0x195   :  { %v200_v25 = vpop.f32.mrf.mxu1 }
 0x196   :  { %v201_v26 = vadd.f32 %v218_v24, %v200_v25 }
 0x197   :  { %v265_v27 = vpop.f32.mrf.mxu1 }
 0x198   :  { %208 = vst.msk [vmem:[%s364_s5] sm:$0xff] %vm207_vm2, %v201_v26 }
 0x199   :  { %v203_v28 = vpop.f32.mrf.mxu1 }
 0x19a   :  { %v204_v29 = vadd.f32 %v218_v24, %v203_v28 }
 0x19b   :  { %v266_v30 = vpop.f32.mrf.mxu1 }
 0x19c   :  { %209 = vst.msk [vmem:[%s364_s5 + $0x8] sm:$0xff] %vm207_vm2, %v204_v29 }

</bundles_post_ra>
